<compile_context>
chip_gen: v7x
topology: tpu7x:2x2x1
jax: 0.10.0
libtpu: 0.0.40
codegen_flags: <defaults>
</compile_context>

<pallas_src>
import jax
import jax.numpy as jnp
from jax.experimental import pallas as pl
from jax.experimental.pallas import tpu as pltpu


def _round_up(x, m):
    return ((x + m - 1) // m) * m


def generator_kernel(z_ref, w1_ref, b1_ref, w2_ref, b2_ref, o_ref):
    # Layer 1: Linear(100 -> 256) + ReLU.
    # bf16 x bf16 -> f32 accumulate on the MXU; bias/ReLU in f32 on the VPU.
    h = jnp.dot(z_ref[...], w1_ref[...], preferred_element_type=jnp.float32)
    h = jnp.maximum(h + b1_ref[...], 0.0)          # (TB, 256) + (1, 256)
    # Layer 2: Linear(256 -> 784pad) + Tanh. Cast activations to bf16 for a
    # single-pass MXU matmul; keep the f32 accumulator and f32 tanh (EUP).
    y = jnp.dot(h.astype(jnp.bfloat16), w2_ref[...],
                preferred_element_type=jnp.float32)
    o_ref[...] = jnp.tanh(y + b2_ref[...]).astype(o_ref.dtype)


def generator_forward(z, w1, b1, w2, b2, *, tb_max=256):
    """z: (B, 100) f32. w1: (100, 256), b1: (256,), w2: (256, 784), b2: (784,).

    Returns (B, 784) f32.
    """
    B, K = z.shape
    K1, H = w1.shape
    K2, O = w2.shape

    Kp = _round_up(K, 128)          # 100 -> 128 (clean contraction tiles)
    Op = _round_up(O, 128)          # 784 -> 896 (lane-dense output stores)

    # bf16 MXU operands, zero-padded to (8,128)-friendly rectangles.
    w1p = jnp.zeros((Kp, H), jnp.bfloat16).at[:K1, :].set(w1.astype(jnp.bfloat16))
    w2p = jnp.zeros((K2, Op), jnp.bfloat16).at[:, :O].set(w2.astype(jnp.bfloat16))
    b1p = b1.reshape(1, H).astype(jnp.float32)
    b2p = jnp.zeros((1, Op), jnp.float32).at[:, :O].set(
        b2.reshape(1, O).astype(jnp.float32))

    flops = 2 * B * (Kp * H + K2 * Op)
    transcendentals = B * Op

    if B <= tb_max:
        # --- Single-tile path: no grid, no pipelining machinery. -------------
        Bp = _round_up(max(B, 8), 8)
        zp = jnp.zeros((Bp, Kp), jnp.bfloat16).at[:B, :K].set(
            z.astype(jnp.bfloat16))
        bytes_accessed = (zp.size + w1p.size + w2p.size) * 2 \
            + (b1p.size + b2p.size + Bp * Op) * 4
        out = pl.pallas_call(
            generator_kernel,
            out_shape=jax.ShapeDtypeStruct((Bp, Op), jnp.float32),
            in_specs=[pl.BlockSpec(memory_space=pltpu.MemorySpace.VMEM)] * 5,
            out_specs=pl.BlockSpec(memory_space=pltpu.MemorySpace.VMEM),
            cost_estimate=pl.CostEstimate(
                flops=flops,
                transcendentals=transcendentals,
                bytes_accessed=bytes_accessed),
        )(zp, w1p, b1p, w2p, b2p)
    else:
        # --- Batch-tiled path: grid over batch, parallel across TCs (v7x). ---
        TB = tb_max
        Bp = _round_up(B, TB)
        zp = jnp.zeros((Bp, Kp), jnp.bfloat16).at[:B, :K].set(
            z.astype(jnp.bfloat16))
        bytes_accessed = (zp.size + w1p.size + w2p.size) * 2 \
            + (b1p.size + b2p.size + Bp * Op) * 4
        out = pl.pallas_call(
            generator_kernel,
            out_shape=jax.ShapeDtypeStruct((Bp, Op), jnp.float32),
            grid=(Bp // TB,),
            in_specs=[
                pl.BlockSpec((TB, Kp), lambda i: (i, 0)),
                pl.BlockSpec((Kp, H), lambda i: (0, 0)),
                pl.BlockSpec((1, H), lambda i: (0, 0)),
                pl.BlockSpec((K2, Op), lambda i: (0, 0)),
                pl.BlockSpec((1, Op), lambda i: (0, 0)),
            ],
            out_specs=pl.BlockSpec((TB, Op), lambda i: (i, 0)),
            compiler_params=pltpu.CompilerParams(
                dimension_semantics=("parallel",)),
            cost_estimate=pl.CostEstimate(
                flops=flops,
                transcendentals=transcendentals,
                bytes_accessed=bytes_accessed),
        )(zp, w1p, b1p, w2p, b2p)

    return out[:B, :O]


def init_params(key):
    # Deterministic synthetic init mimicking nn.Linear's U(-1/sqrt(fan_in), +).
    # Stored as (in_features, out_features) / (out_features,), f32 "master" copy.
    k1, k2, k3, k4 = jax.random.split(key, 4)
    lim1 = 1.0 / jnp.sqrt(100.0)
    lim2 = 1.0 / jnp.sqrt(256.0)
    w1 = jax.random.uniform(k1, (100, 256), jnp.float32, -lim1, lim1)
    b1 = jax.random.uniform(k2, (256,), jnp.float32, -lim1, lim1)
    w2 = jax.random.uniform(k3, (256, 784), jnp.float32, -lim2, lim2)
    b2 = jax.random.uniform(k4, (784,), jnp.float32, -lim2, lim2)
    return w1, b1, w2, b2


def reference_forward(z, w1, b1, w2, b2):
    # Pure f32 reference (PyTorch semantics).
    h = jnp.maximum(z @ w1 + b1[None, :], 0.0)
    return jnp.tanh(h @ w2 + b2[None, :])


if __name__ == "__main__":
    key = jax.random.PRNGKey(0)
    kz, kp = jax.random.split(key)
    # z like torch.randn(10, 100)
    z = jax.random.normal(kz, (10, 100), jnp.float32)
    w1, b1, w2, b2 = init_params(kp)

    # Small-batch (no-grid) path.
    out = generator_forward(z, w1, b1, w2, b2)
    out = jax.block_until_ready(out)
    ref = reference_forward(z, w1, b1, w2, b2)
    assert out.shape == (10, 784)
    # bf16 MXU operands -> looser tolerance than pure f32.
    assert jnp.allclose(out, ref, atol=2e-2, rtol=0.0), (
        float(jnp.max(jnp.abs(out - ref))))

    # Exercise the batch-tiled ("parallel" grid) path at small size.
    z_big = jax.random.normal(kz, (40, 100), jnp.float32)
    out_big = generator_forward(z_big, w1, b1, w2, b2, tb_max=16)
    out_big = jax.block_until_ready(out_big)
    ref_big = reference_forward(z_big, w1, b1, w2, b2)
    assert out_big.shape == (40, 784)
    assert jnp.allclose(out_big, ref_big, atol=2e-2, rtol=0.0), (
        float(jnp.max(jnp.abs(out_big - ref_big))))

    print("KERNEL_OK")
</pallas_src>

<mosaic_0001>
module attributes {stable_mosaic.version = 11 : i64} {
  func.func @generator_kernel(%arg0: memref<16x128xbf16, #tpu.memory_space<vmem>>, %arg1: memref<128x256xbf16, #tpu.memory_space<vmem>>, %arg2: memref<1x256xf32, #tpu.memory_space<vmem>>, %arg3: memref<256x896xbf16, #tpu.memory_space<vmem>>, %arg4: memref<1x896xf32, #tpu.memory_space<vmem>>, %arg5: memref<16x896xf32, #tpu.memory_space<vmem>>) attributes {dimension_semantics = [], scalar_prefetch = 0 : i64, scratch_operands = 0 : i64, tpu.core_type = #tpu.core_type<tc>} {
    %c0 = arith.constant 0 : index
    %c0_0 = arith.constant 0 : index
    %0 = vector.load %arg0[%c0, %c0_0] : memref<16x128xbf16, #tpu.memory_space<vmem>>, vector<16x128xbf16>
    %c0_1 = arith.constant 0 : index
    %c0_2 = arith.constant 0 : index
    %1 = vector.load %arg1[%c0_1, %c0_2] : memref<128x256xbf16, #tpu.memory_space<vmem>>, vector<128x256xbf16>
    %cst = arith.constant dense<0.000000e+00> : vector<16x256xf32>
    %2 = tpu.matmul %0, %1, %cst {dimension_numbers = #tpu.dot_dimension_numbers<[1], [0], [0], [1], [0, 0, 1, 1], [], []>} : vector<16x128xbf16>, vector<128x256xbf16>, vector<16x256xf32> -> vector<16x256xf32>
    %c0_3 = arith.constant 0 : index
    %c0_4 = arith.constant 0 : index
    %3 = vector.load %arg2[%c0_3, %c0_4] : memref<1x256xf32, #tpu.memory_space<vmem>>, vector<1x256xf32>
    %4 = vector.broadcast %3 : vector<1x256xf32> to vector<16x256xf32>
    %5 = arith.addf %2, %4 : vector<16x256xf32>
    %cst_5 = arith.constant 0.000000e+00 : f32
    %6 = vector.broadcast %cst_5 : f32 to vector<16x256xf32>
    %7 = arith.maximumf %5, %6 : vector<16x256xf32>
    %8 = arith.truncf %7 : vector<16x256xf32> to vector<16x256xbf16>
    %c0_6 = arith.constant 0 : index
    %c0_7 = arith.constant 0 : index
    %9 = vector.load %arg3[%c0_6, %c0_7] : memref<256x896xbf16, #tpu.memory_space<vmem>>, vector<256x896xbf16>
    %cst_8 = arith.constant dense<0.000000e+00> : vector<16x896xf32>
    %10 = tpu.matmul %8, %9, %cst_8 {dimension_numbers = #tpu.dot_dimension_numbers<[1], [0], [0], [1], [0, 0, 1, 1], [], []>} : vector<16x256xbf16>, vector<256x896xbf16>, vector<16x896xf32> -> vector<16x896xf32>
    %c0_9 = arith.constant 0 : index
    %c0_10 = arith.constant 0 : index
    %11 = vector.load %arg4[%c0_9, %c0_10] : memref<1x896xf32, #tpu.memory_space<vmem>>, vector<1x896xf32>
    %12 = vector.broadcast %11 : vector<1x896xf32> to vector<16x896xf32>
    %13 = arith.addf %10, %12 : vector<16x896xf32>
    %14 = math.tanh %13 : vector<16x896xf32>
    %c0_11 = arith.constant 0 : index
    %c0_12 = arith.constant 0 : index
    %15 = vector.load %arg5[%c0_11, %c0_12] : memref<16x896xf32, #tpu.memory_space<vmem>>, vector<16x896xf32>
    tpu.vector_store %arg5[%c0_11, %c0_12], %14 {strides = array<i32>} : memref<16x896xf32, #tpu.memory_space<vmem>>, vector<16x896xf32>,
    return
  }
}

</mosaic_0001>

<bundles_post_ra>
// kernel: tpu_custom_call.1
= control target key start
LH: loop header
LB: loop body
LE: loop exit
PB: predicated region body
PF: predicated region fallthrough
CT: control target
= control target key end

     0   :  { %10 = vsyncpa [#allocation3], 0  ;;  %s1785_s0 = inlined_call_operand.hbm [shape: bf16[16,128], index: 0, kind: input, shape index: {}]   ;;  %s1786_s1 = inlined_call_operand.hbm [shape: bf16[128,256], index: 1, kind: input, shape index: {}]   ;;  %s1787_s2 = inlined_call_operand.vmem [shape: f32[1,256], index: 2, kind: input, shape index: {}]   ;;  %s1788_s3 = inlined_call_operand.hbm [shape: bf16[256,896], index: 3, kind: input, shape index: {}]   ;;  %s1789_s4 = inlined_call_operand.vmem [shape: f32[1,896], index: 4, kind: input, shape index: {}]   ;;  %s1790_s5 = inlined_call_operand.hbm [shape: f32[16,896], index: 5, kind: output, shape index: {}]  }
   0x1   :  { %11 = vsyncpa [#allocation6], 0 }
   0x2   :  { %12 = vsyncpa [#allocation4], 0  ;;  %s1656_s18 = smov [#allocation5]   ;;  %s1562_s22 = scalar_lea.hbm %s1786_s1, 2048 }
   0x3   :  { %s30_s19 = sshll.u32 %s1656_s18, 4  ;;  %p1563_p0 = scmp.ne.s32.totalorder %s1786_s1, %s1562_s22  ;;  %s31_s19 = int_to_ptr.vmem [resolvable:$true] %s30_s19 }
   0x4   :  { %p1566_p1 = scmp.lt.u32.totalorder %s1562_s22, %s1786_s1 }
   0x6   :  { %p1568_p2 = pnand %p1566_p1, %p1563_p0 }
   0x8   :  { %1571 = shalt.err (!%p1568_p2)
}
   0x9   :  { %s1572_s27 = scalar_lea.vmem %s31_s19, 2048  ;;  %p1577_p4 = scmp.lt.s32.totalorder %s31_s19, %s31_s19 }
   0xa   :  { %p1573_p3 = scmp.ne.s32.totalorder %s31_s19, %s1572_s27  ;;  %p1578_p5 = scmp.lt.s32.totalorder %s1572_s27, %s1572_s27 }
   0xc   :  { %p1579_p6 = por %p1578_p5, %p1577_p4 }
   0xe   :  { %p1580_p7 = pnand %p1579_p6, %p1573_p3 }
  0x10   :  { %1583 = shalt.err (!%p1580_p7)
}
  0x11   :  { %s1657_s28 = smov 128   ;;  %s1658_s29 = smov 8  }
  0x12   :  { %36 = dma.hbm_to_vmem [thread:$0]  %s1786_s1, 2048, %s31_s19, [#allocation6], %s1657_s28, %s1657_s28, %s1658_s29  }
  0x13   :  { %s1659_s7 = smov [#allocation2]   ;;  %s1584_s11 = scalar_lea.hbm %s1785_s0, 128 }
  0x14   :  { %s18_s8 = sshll.u32 %s1659_s7, 4  ;;  %p1585_p8 = scmp.ne.s32.totalorder %s1785_s0, %s1584_s11  ;;  %s19_s8 = int_to_ptr.vmem [resolvable:$true] %s18_s8 }
  0x15   :  { %p1588_p9 = scmp.lt.u32.totalorder %s1584_s11, %s1785_s0 }
  0x17   :  { %p1590_p10 = pnand %p1588_p9, %p1585_p8 }
  0x19   :  { %1593 = shalt.err (!%p1590_p10)
}
  0x1a   :  { %s1594_s16 = scalar_lea.vmem %s19_s8, 128  ;;  %p1599_p12 = scmp.lt.s32.totalorder %s19_s8, %s19_s8 }
  0x1b   :  { %p1595_p11 = scmp.ne.s32.totalorder %s19_s8, %s1594_s16  ;;  %p1600_p13 = scmp.lt.s32.totalorder %s1594_s16, %s1594_s16 }
  0x1d   :  { %p1601_p0 = por %p1600_p13, %p1599_p12 }
  0x1f   :  { %p1602_p1 = pnand %p1601_p0, %p1595_p11 }
  0x21   :  { %1605 = shalt.err (!%p1602_p1)
}
  0x22   :  { %s1660_s1 = smov 64   ;;  %s1661_s17 = smov 4  }
  0x23   :  { %24 = dma.hbm_to_vmem [thread:$0]  %s1785_s0, 128, %s19_s8, [#allocation3], %s1660_s1, %s1660_s1, %s1661_s17  }
  0x24   :  { %s1662_s20 = smov [#allocation7]   ;;  %s1606_s24 = scalar_lea.hbm %s1788_s3, 14336 }
  0x25   :  { %s44_s21 = sshll.u32 %s1662_s20, 4  ;;  %p1607_p2 = scmp.ne.s32.totalorder %s1788_s3, %s1606_s24  ;;  %s45_s21 = int_to_ptr.vmem [resolvable:$true] %s44_s21 }
  0x26   :  { %p1610_p3 = scmp.lt.u32.totalorder %s1606_s24, %s1788_s3 }
  0x28   :  { %p1612_p4 = pnand %p1610_p3, %p1607_p2 }
  0x2a   :  { %1615 = shalt.err (!%p1612_p4)
}
  0x2b   :  { %s1616_s29 = scalar_lea.vmem %s45_s21, 14336  ;;  %p1621_p6 = scmp.lt.s32.totalorder %s45_s21, %s45_s21 }
  0x2c   :  { %p1617_p5 = scmp.ne.s32.totalorder %s45_s21, %s1616_s29  ;;  %p1622_p7 = scmp.lt.s32.totalorder %s1616_s29, %s1616_s29 }
  0x2e   :  { %p1623_p8 = por %p1622_p7, %p1621_p6 }
  0x30   :  { %p1624_p9 = pnand %p1623_p8, %p1617_p5 }
  0x32   :  { %1627 = shalt.err (!%p1624_p9)
}
  0x33   :  { %s1663_s0 = smov 448   ;;  %s1664_s30 = smov 28  }
  0x34   :  { %50 = dma.hbm_to_vmem [thread:$0]  %s1788_s3, 14336, %s45_s21, [#allocation6], %s1663_s0, %s1663_s0, %s1664_s30  }
  0x35   :  { %1650 = dma.done.wait [#allocation3], 128  }
  0x36   :  { %1651 = vsyncadd [#allocation3], 4294967168 }
  0x37   :  { %1652 = dma.done.wait [#allocation6], 16384  }
  0x38   :  { %1653 = vsyncadd [#allocation6], 4294950912  ;;  %v1665_v0 = vmov 0   ;;  %v1349_v1 = vld [vmem:[#allocation5 + $0x4] ss:$8 sps:$4 sm:$0xff]   ;;  %v1373_v29 = vld [vmem:[#allocation2] sm:$0xff]  }
  0x39   :  { %211 = vmatprep.mubr.bf16.mxu0 %v1665_v0  ;;  %v1351_v2 = vld [vmem:[#allocation5] ss:$8 sps:$4 sm:$0xff]   ;;  %179 = vmatprep.subr.bf16.mxu0 %v1349_v1  ;;  %v1352_v3 = vld [vmem:[#allocation5 + $0x14] ss:$8 sps:$4 sm:$0xff]   ;;  %v1354_v4 = vld [vmem:[#allocation5 + $0x10] ss:$8 sps:$4 sm:$0xff]  }
  0x3a   :  { %180 = vmatpush1.bf16.msra.mxu0 %v1351_v2  ;;  %v1355_v5 = vld [vmem:[#allocation5 + $0x24] ss:$8 sps:$4 sm:$0xff]   ;;  %v1357_v6 = vld [vmem:[#allocation5 + $0x20] ss:$8 sps:$4 sm:$0xff]   ;;  %v1358_v7 = vld [vmem:[#allocation5 + $0x34] ss:$8 sps:$4 sm:$0xff]  }
  0x3b   :  { %181 = vmatprep.subr.bf16.mxu0 %v1352_v3  ;;  %v1360_v8 = vld [vmem:[#allocation5 + $0x30] ss:$8 sps:$4 sm:$0xff]   ;;  %v1361_v9 = vld [vmem:[#allocation5 + $0x44] ss:$8 sps:$4 sm:$0xff]   ;;  %v1363_v11 = vld [vmem:[#allocation5 + $0x40] ss:$8 sps:$4 sm:$0xff]  }
  0x3c   :  { %v1374_v10 = vld [vmem:[#allocation7 + $0x4] ss:$28 sps:$4 sm:$0xff]   ;;  %v1380_v13 = vld [vmem:[#allocation7 + $0x3c] ss:$28 sps:$4 sm:$0xff]   ;;  %v1386_v16 = vld [vmem:[#allocation7 + $0x74] ss:$28 sps:$4 sm:$0xff]  }
  0x3d   :  { %969 = vmatprep.subr.bf16.mxu1 %v1374_v10  ;;  %v1379_v12 = vld [vmem:[#allocation7] ss:$28 sps:$4 sm:$0xff]   ;;  %v1385_v15 = vld [vmem:[#allocation7 + $0x38] ss:$28 sps:$4 sm:$0xff]   ;;  %v1367_v18 = vld [vmem:[#allocation5 + $0x64] ss:$8 sps:$4 sm:$0xff]  }
  0x3e   :  { %182 = vmatpush1.bf16.msra.mxu0 %v1354_v4  ;;  %v1364_v14 = vld [vmem:[#allocation5 + $0x54] ss:$8 sps:$4 sm:$0xff]   ;;  %970 = vmatpush1.bf16.msra.mxu1 %v1379_v12  ;;  %v1366_v17 = vld [vmem:[#allocation5 + $0x50] ss:$8 sps:$4 sm:$0xff]   ;;  %v1392_v20 = vld [vmem:[#allocation7 + $0xac] ss:$28 sps:$4 sm:$0xff]  }
  0x3f   :  { %183 = vmatprep.subr.bf16.mxu0 %v1355_v5  ;;  %971 = vmatprep.subr.bf16.mxu1 %v1380_v13  ;;  %v1391_v19 = vld [vmem:[#allocation7 + $0x70] ss:$28 sps:$4 sm:$0xff]   ;;  %v1369_v21 = vld [vmem:[#allocation5 + $0x60] ss:$8 sps:$4 sm:$0xff]   ;;  %v1370_v22 = vld [vmem:[#allocation5 + $0x74] ss:$8 sps:$4 sm:$0xff]  }
  0x40   :  { %v1397_v23 = vld [vmem:[#allocation7 + $0xa8] ss:$28 sps:$4 sm:$0xff]   ;;  %v1372_v25 = vld [vmem:[#allocation5 + $0x70] ss:$8 sps:$4 sm:$0xff]   ;;  %v1403_v27 = vld [vmem:[#allocation7 + $0xe0] ss:$28 sps:$4 sm:$0xff]  }
  0x41   :  { %v1398_v24 = vld [vmem:[#allocation7 + $0xe4] ss:$28 sps:$4 sm:$0xff]   ;;  %v1378_v26 = vld [vmem:[#allocation7 + $0xc] ss:$28 sps:$4 sm:$0xff]   ;;  %v1404_v28 = vld [vmem:[#allocation7 + $0x11c] ss:$28 sps:$4 sm:$0xff]  }
  0x42   :  { %184 = vmatpush1.bf16.msra.mxu0 %v1357_v6  ;;  %972 = vmatpush1.bf16.msra.mxu1 %v1385_v15  ;;  %v1376_v30 = vld [vmem:[#allocation7 + $0x8] ss:$28 sps:$4 sm:$0xff]   ;;  %v1409_v32 = vld [vmem:[#allocation7 + $0x118] ss:$28 sps:$4 sm:$0xff]   ;;  %v1382_v34 = vld [vmem:[#allocation7 + $0x40] ss:$28 sps:$4 sm:$0xff]  }
  0x43   :  { %185 = vmatprep.subr.bf16.mxu0 %v1358_v7  ;;  %973 = vmatprep.subr.bf16.mxu1 %v1386_v16  ;;  %v1384_v31 = vld [vmem:[#allocation7 + $0x44] ss:$28 sps:$4 sm:$0xff]   ;;  %v1410_v33 = vld [vmem:[#allocation7 + $0x154] ss:$28 sps:$4 sm:$0xff]   ;;  %v1390_v35 = vld [vmem:[#allocation7 + $0x7c] ss:$28 sps:$4 sm:$0xff]  }
  0x44   :  { %v1415_v36 = vld [vmem:[#allocation7 + $0x150] ss:$28 sps:$4 sm:$0xff]   ;;  %v1388_v38 = vld [vmem:[#allocation7 + $0x78] ss:$28 sps:$4 sm:$0xff]   ;;  %v1421_v40 = vld [vmem:[#allocation7 + $0x188] ss:$28 sps:$4 sm:$0xff]  }
  0x45   :  { %v1416_v37 = vld [vmem:[#allocation7 + $0x18c] ss:$28 sps:$4 sm:$0xff]   ;;  %v1396_v39 = vld [vmem:[#allocation7 + $0xb4] ss:$28 sps:$4 sm:$0xff]   ;;  %v1422_v41 = vld [vmem:[#allocation7 + $0x1c4] ss:$28 sps:$4 sm:$0xff]  }
  0x46   :  { %186 = vmatpush1.bf16.msra.mxu0 %v1360_v8  ;;  %974 = vmatpush1.bf16.msra.mxu1 %v1391_v19  ;;  %v1394_v42 = vld [vmem:[#allocation7 + $0xb0] ss:$28 sps:$4 sm:$0xff]   ;;  %v1427_v44 = vld [vmem:[#allocation7 + $0x1c0] ss:$28 sps:$4 sm:$0xff]   ;;  %v1400_v46 = vld [vmem:[#allocation7 + $0xe8] ss:$28 sps:$4 sm:$0xff]  }
  0x47   :  { %187 = vmatprep.subr.bf16.mxu0 %v1361_v9  ;;  %975 = vmatprep.subr.bf16.mxu1 %v1392_v20  ;;  %v1402_v43 = vld [vmem:[#allocation7 + $0xec] ss:$28 sps:$4 sm:$0xff]   ;;  %v1428_v45 = vld [vmem:[#allocation7 + $0x1fc] ss:$28 sps:$4 sm:$0xff]   ;;  %v1408_v47 = vld [vmem:[#allocation7 + $0x124] ss:$28 sps:$4 sm:$0xff]   ;;  %v83_v20 = vlaneseq }
  0x48   :  { %v1433_v48 = vld [vmem:[#allocation7 + $0x1f8] ss:$28 sps:$4 sm:$0xff]   ;;  %v1406_v49 = vld [vmem:[#allocation7 + $0x120] ss:$28 sps:$4 sm:$0xff]   ;;  %v1439_v52 = vld [vmem:[#allocation7 + $0x230] ss:$28 sps:$4 sm:$0xff]  }
  0x49   :  { %v1434_v50 = vld [vmem:[#allocation7 + $0x234] ss:$28 sps:$4 sm:$0xff]   ;;  %v1414_v51 = vld [vmem:[#allocation7 + $0x15c] ss:$28 sps:$4 sm:$0xff]   ;;  %v1440_v53 = vld [vmem:[#allocation7 + $0x26c] ss:$28 sps:$4 sm:$0xff]  }
  0x4a   :  { %188 = vmatpush1.bf16.msra.mxu0 %v1363_v11  ;;  %976 = vmatpush1.bf16.msra.mxu1 %v1397_v23  ;;  %v1412_v54 = vld [vmem:[#allocation7 + $0x158] ss:$28 sps:$4 sm:$0xff]   ;;  %v1445_v56 = vld [vmem:[#allocation7 + $0x268] ss:$28 sps:$4 sm:$0xff]   ;;  %v1418_v58 = vld [vmem:[#allocation7 + $0x190] ss:$28 sps:$4 sm:$0xff]  }
  0x4b   :  { %189 = vmatprep.subr.bf16.mxu0 %v1364_v14  ;;  %977 = vmatprep.subr.bf16.mxu1 %v1398_v24  ;;  %v1420_v55 = vld [vmem:[#allocation7 + $0x194] ss:$28 sps:$4 sm:$0xff]   ;;  %v1446_v57 = vld [vmem:[#allocation7 + $0x2a4] ss:$28 sps:$4 sm:$0xff]   ;;  %v1426_v59 = vld [vmem:[#allocation7 + $0x1cc] ss:$28 sps:$4 sm:$0xff]  }
  0x4c   :  { %v1451_v60 = vld [vmem:[#allocation7 + $0x2a0] ss:$28 sps:$4 sm:$0xff]   ;;  %v1424_v62 = vld [vmem:[#allocation7 + $0x1c8] ss:$28 sps:$4 sm:$0xff]   ;;  %v1457_v0 = vld [vmem:[#allocation7 + $0x2d8] ss:$28 sps:$4 sm:$0xff]  }
  0x4d   :  { %v1452_v61 = vld [vmem:[#allocation7 + $0x2dc] ss:$28 sps:$4 sm:$0xff]   ;;  %v1432_v63 = vld [vmem:[#allocation7 + $0x204] ss:$28 sps:$4 sm:$0xff]   ;;  %v1444_v4 = vld [vmem:[#allocation7 + $0x274] ss:$28 sps:$4 sm:$0xff]  }
  0x4e   :  { %190 = vmatpush1.bf16.msra.mxu0 %v1366_v17  ;;  %978 = vmatpush1.bf16.msra.mxu1 %v1403_v27  ;;  %v1430_v1 = vld [vmem:[#allocation7 + $0x200] ss:$28 sps:$4 sm:$0xff]   ;;  %v1436_v3 = vld [vmem:[#allocation7 + $0x238] ss:$28 sps:$4 sm:$0xff]   ;;  %v1442_v5 = vld [vmem:[#allocation7 + $0x270] ss:$28 sps:$4 sm:$0xff]  }
  0x4f   :  { %191 = vmatprep.subr.bf16.mxu0 %v1367_v18  ;;  %979 = vmatprep.subr.bf16.mxu1 %v1404_v28  ;;  %v1438_v2 = vld [vmem:[#allocation7 + $0x23c] ss:$28 sps:$4 sm:$0xff]   ;;  %v1450_v6 = vld [vmem:[#allocation7 + $0x2ac] ss:$28 sps:$4 sm:$0xff]   ;;  %v1456_v8 = vld [vmem:[#allocation7 + $0x2e4] ss:$28 sps:$4 sm:$0xff]  }
  0x50   :  { %v1448_v7 = vld [vmem:[#allocation7 + $0x2a8] ss:$28 sps:$4 sm:$0xff]   ;;  %v1454_v9 = vld [vmem:[#allocation7 + $0x2e0] ss:$28 sps:$4 sm:$0xff]   ;;  %v1458_v10 = vld [vmem:[#allocation7 + $0x314] ss:$28 sps:$4 sm:$0xff]  }
  0x51   :  { %v1462_v11 = vld [vmem:[#allocation7 + $0x31c] ss:$28 sps:$4 sm:$0xff]   ;;  %v1463_v13 = vld [vmem:[#allocation7 + $0x310] ss:$28 sps:$4 sm:$0xff]   ;;  %v1469_v17 = vld [vmem:[#allocation7 + $0x348] ss:$28 sps:$4 sm:$0xff]  }
  0x52   :  { %192 = vmatpush1.bf16.msra.mxu0 %v1369_v21  ;;  %980 = vmatpush1.bf16.msra.mxu1 %v1409_v32  ;;  %v1460_v12 = vld [vmem:[#allocation7 + $0x318] ss:$28 sps:$4 sm:$0xff]   ;;  %v1464_v14 = vld [vmem:[#allocation7 + $0x34c] ss:$28 sps:$4 sm:$0xff]   ;;  %v1735_v21 = vshrl.u32 %v83_v20, 7 }
  0x53   :  { %193 = vmatprep.subr.bf16.mxu0 %v1370_v22  ;;  %981 = vmatprep.subr.bf16.mxu1 %v1410_v33  ;;  %v1468_v15 = vld [vmem:[#allocation7 + $0x354] ss:$28 sps:$4 sm:$0xff]   ;;  %v81_v23 = vld [vmem:[%s1787_s2] sm:$0x3]  ;;  %v1528_v20 = vld [vmem:[#allocation7 + $0x320] ss:$28 sps:$4 sm:$0xff]  }
  0x54   :  { %v1466_v16 = vld [vmem:[#allocation7 + $0x350] ss:$28 sps:$4 sm:$0xff]   ;;  %v1473_v19 = vld [vmem:[#allocation7 + $0x1d8] ss:$28 sps:$4 sm:$0xff]   ;;  %v85_v22 = vsub.s32 0, %v1735_v21  ;;  %v89_v24 = vsub.s32 1, %v1735_v21 }
  0x55   :  { %v1472_v18 = vld [vmem:[#allocation7 + $0x14] ss:$28 sps:$4 sm:$0xff]  }
  0x56   :  { %194 = vmatpush1.bf16.msra.mxu0 %v1372_v25  ;;  %982 = vmatpush1.bf16.msra.mxu1 %v1415_v36  ;;  %v86_v25 = vrot.slane %v81_v23, %v85_v22 }
  0x57   :  { %1012 = vmatprep.subr.bf16.mxu0 %v1378_v26  ;;  %983 = vmatprep.subr.bf16.mxu1 %v1416_v37  ;;  %v90_v26 = vrot.slane %v81_v23, %v89_v24  ;;  %v1533_v23 = vld [vmem:[#allocation7 + $0x35c] ss:$28 sps:$4 sm:$0xff]  }
  0x59   :  { %212 = vmatmul.mubr.bf16.vlgmr.msra.gmra.mrb[0].mxu0 %v1373_v29 }
  0x5a   :  { %1013 = vmatpush1.bf16.msra.mxu0 %v1376_v30  ;;  %984 = vmatpush1.bf16.msra.mxu1 %v1421_v40 }
  0x5b   :  { %1014 = vmatprep.subr.bf16.mxu0 %v1384_v31  ;;  %985 = vmatprep.subr.bf16.mxu1 %v1422_v41  ;;  %v1470_v41 = vld [vmem:[#allocation7 + $0x10] ss:$28 sps:$4 sm:$0xff]  }
  0x5e   :  { %1015 = vmatpush1.bf16.msra.mxu0 %v1382_v34  ;;  %986 = vmatpush1.bf16.msra.mxu1 %v1427_v44  ;;  %v1478_v44 = vld [vmem:[#allocation7 + $0x210] ss:$28 sps:$4 sm:$0xff]  }
  0x5f   :  { %1016 = vmatprep.subr.bf16.mxu0 %v1390_v35  ;;  %987 = vmatprep.subr.bf16.mxu1 %v1428_v45  ;;  %v1475_v45 = vld [vmem:[#allocation7 + $0x48] ss:$28 sps:$4 sm:$0xff]  }
  0x62   :  { %1017 = vmatpush1.bf16.msra.mxu0 %v1388_v38  ;;  %988 = vmatpush1.bf16.msra.mxu1 %v1433_v48  ;;  %v1483_v48 = vld [vmem:[#allocation7 + $0x248] ss:$28 sps:$4 sm:$0xff]  }
  0x63   :  { %1018 = vmatprep.subr.bf16.mxu0 %v1396_v39  ;;  %989 = vmatprep.subr.bf16.mxu1 %v1434_v50  ;;  %v1484_v50 = vld [vmem:[#allocation7 + $0x88] ss:$28 sps:$4 sm:$0xff]  }
  0x66   :  { %1019 = vmatpush1.bf16.msra.mxu0 %v1394_v42  ;;  %990 = vmatpush1.bf16.msra.mxu1 %v1439_v52  ;;  %v1474_v42 = vld [vmem:[#allocation7 + $0x18] ss:$28 sps:$4 sm:$0xff]   ;;  %v1488_v52 = vld [vmem:[#allocation7 + $0x280] ss:$28 sps:$4 sm:$0xff]  }
  0x67   :  { %1020 = vmatprep.subr.bf16.mxu0 %v1402_v43  ;;  %991 = vmatprep.subr.bf16.mxu1 %v1440_v53  ;;  %v1477_v43 = vld [vmem:[#allocation7 + $0x4c] ss:$28 sps:$4 sm:$0xff]   ;;  %v1485_v53 = vld [vmem:[#allocation7 + $0xb8] ss:$28 sps:$4 sm:$0xff]  }
  0x6a   :  { %1021 = vmatpush1.bf16.msra.mxu0 %v1400_v46  ;;  %992 = vmatpush1.bf16.msra.mxu1 %v1445_v56  ;;  %v1479_v46 = vld [vmem:[#allocation7 + $0x50] ss:$28 sps:$4 sm:$0xff]   ;;  %v1493_v56 = vld [vmem:[#allocation7 + $0x2b8] ss:$28 sps:$4 sm:$0xff]  }
  0x6b   :  { %1022 = vmatprep.subr.bf16.mxu0 %v1408_v47  ;;  %993 = vmatprep.subr.bf16.mxu1 %v1446_v57  ;;  %v1482_v47 = vld [vmem:[#allocation7 + $0x84] ss:$28 sps:$4 sm:$0xff]   ;;  %v1490_v57 = vld [vmem:[#allocation7 + $0xf0] ss:$28 sps:$4 sm:$0xff]  }
  0x6e   :  { %1023 = vmatpush1.bf16.msra.mxu0 %v1406_v49  ;;  %994 = vmatpush1.bf16.msra.mxu1 %v1451_v60  ;;  %v1480_v49 = vld [vmem:[#allocation7 + $0x80] ss:$28 sps:$4 sm:$0xff]   ;;  %v1498_v60 = vld [vmem:[#allocation7 + $0x2f0] ss:$28 sps:$4 sm:$0xff]  }
  0x6f   :  { %1024 = vmatprep.subr.bf16.mxu0 %v1414_v51  ;;  %995 = vmatprep.subr.bf16.mxu1 %v1452_v61  ;;  %v1487_v51 = vld [vmem:[#allocation7 + $0xbc] ss:$28 sps:$4 sm:$0xff]   ;;  %v1495_v61 = vld [vmem:[#allocation7 + $0x128] ss:$28 sps:$4 sm:$0xff]  }
  0x72   :  { %1025 = vmatpush1.bf16.msra.mxu0 %v1412_v54  ;;  %996 = vmatpush1.bf16.msra.mxu1 %v1457_v0  ;;  %v1489_v54 = vld [vmem:[#allocation7 + $0xc0] ss:$28 sps:$4 sm:$0xff]   ;;  %v1503_v0 = vld [vmem:[#allocation7 + $0x328] ss:$28 sps:$4 sm:$0xff]  }
  0x73   :  { %1026 = vmatprep.subr.bf16.mxu0 %v1420_v55  ;;  %997 = vmatprep.subr.bf16.mxu1 %v1458_v10  ;;  %v1492_v55 = vld [vmem:[#allocation7 + $0xf4] ss:$28 sps:$4 sm:$0xff]   ;;  %v1513_v10 = vld [vmem:[#allocation7 + $0x208] ss:$28 sps:$4 sm:$0xff]  }
  0x76   :  { %1027 = vmatpush1.bf16.msra.mxu0 %v1418_v58  ;;  %998 = vmatpush1.bf16.msra.mxu1 %v1463_v13  ;;  %v1494_v58 = vld [vmem:[#allocation7 + $0xf8] ss:$28 sps:$4 sm:$0xff]  }
  0x77   :  { %1028 = vmatprep.subr.bf16.mxu0 %v1426_v59  ;;  %999 = vmatprep.subr.bf16.mxu1 %v1464_v14  ;;  %v1497_v59 = vld [vmem:[#allocation7 + $0x12c] ss:$28 sps:$4 sm:$0xff]   ;;  %v1521_v13 = vld [vmem:[#allocation7 + $0x27c] ss:$28 sps:$4 sm:$0xff]  }
  0x78   :  { %v1519_v14 = vld [vmem:[#allocation7 + $0x278] ss:$28 sps:$4 sm:$0xff]  }
  0x7a   :  { %1029 = vmatpush1.bf16.msra.mxu0 %v1424_v62  ;;  %1000 = vmatpush1.bf16.msra.mxu1 %v1469_v17  ;;  %v1499_v62 = vld [vmem:[#allocation7 + $0x130] ss:$28 sps:$4 sm:$0xff]  }
  0x7b   :  { %1030 = vmatprep.subr.bf16.mxu0 %v1432_v63  ;;  %1055 = vmatprep.subr.bf16.mxu1 %v1472_v18  ;;  %v1502_v63 = vld [vmem:[#allocation7 + $0x164] ss:$28 sps:$4 sm:$0xff]   ;;  %v1527_v17 = vld [vmem:[#allocation7 + $0x2ec] ss:$28 sps:$4 sm:$0xff]  }
  0x7c   :  { %v1525_v18 = vld [vmem:[#allocation7 + $0x2e8] ss:$28 sps:$4 sm:$0xff]  }
  0x7e   :  { %1031 = vmatpush1.bf16.msra.mxu0 %v1430_v1  ;;  %v1500_v1 = vld [vmem:[#allocation7 + $0x160] ss:$28 sps:$4 sm:$0xff]  }
  0x7f   :  { %1032 = vmatprep.subr.bf16.mxu0 %v1438_v2  ;;  %v1504_v2 = vld [vmem:[#allocation7 + $0x168] ss:$28 sps:$4 sm:$0xff]  }
  0x82   :  { %1033 = vmatpush1.bf16.msra.mxu0 %v1436_v3  ;;  %v1507_v3 = vld [vmem:[#allocation7 + $0x19c] ss:$28 sps:$4 sm:$0xff]  }
  0x83   :  { %1034 = vmatprep.subr.bf16.mxu0 %v1444_v4  ;;  %v1508_v4 = vld [vmem:[#allocation7 + $0x360] ss:$28 sps:$4 sm:$0xff]  }
  0x86   :  { %1035 = vmatpush1.bf16.msra.mxu0 %v1442_v5  ;;  %v1505_v5 = vld [vmem:[#allocation7 + $0x198] ss:$28 sps:$4 sm:$0xff]  }
  0x87   :  { %1036 = vmatprep.subr.bf16.mxu0 %v1450_v6  ;;  %v1509_v6 = vld [vmem:[#allocation7 + $0x1a0] ss:$28 sps:$4 sm:$0xff]  }
  0x8a   :  { %1037 = vmatpush1.bf16.msra.mxu0 %v1448_v7  ;;  %v1512_v7 = vld [vmem:[#allocation7 + $0x1d4] ss:$28 sps:$4 sm:$0xff]  }
  0x8b   :  { %1038 = vmatprep.subr.bf16.mxu0 %v1456_v8  ;;  %v1510_v8 = vld [vmem:[#allocation7 + $0x1d0] ss:$28 sps:$4 sm:$0xff]  }
  0x8e   :  { %1039 = vmatpush1.bf16.msra.mxu0 %v1454_v9  ;;  %v1515_v9 = vld [vmem:[#allocation7 + $0x20c] ss:$28 sps:$4 sm:$0xff]  }
  0x8f   :  { %1040 = vmatprep.subr.bf16.mxu0 %v1462_v11  ;;  %v1518_v11 = vld [vmem:[#allocation7 + $0x244] ss:$28 sps:$4 sm:$0xff]  }
  0x92   :  { %1041 = vmatpush1.bf16.msra.mxu0 %v1460_v12  ;;  %v1516_v12 = vld [vmem:[#allocation7 + $0x240] ss:$28 sps:$4 sm:$0xff]  }
  0x93   :  { %1042 = vmatprep.subr.bf16.mxu0 %v1468_v15  ;;  %v1524_v15 = vld [vmem:[#allocation7 + $0x2b4] ss:$28 sps:$4 sm:$0xff]  }
  0x96   :  { %1043 = vmatpush1.bf16.msra.mxu0 %v1466_v16  ;;  %v1522_v16 = vld [vmem:[#allocation7 + $0x2b0] ss:$28 sps:$4 sm:$0xff]  }
  0x97   :  { %1314 = vmatprep.subr.bf16.mxu0 %v1473_v19  ;;  %v1530_v19 = vld [vmem:[#allocation7 + $0x324] ss:$28 sps:$4 sm:$0xff]  }
 0x12c   :  { %v213_v27 = vpop.f32.mrb[0].mxu0 }
 0x12d   :  { %v214_v28 = vadd.f32 %v213_v27, %v86_v25  ;;  %v215_v29 = vpop.f32.mrb[1].mxu0  ;;  %v1756_v27 = vld [vmem:[%s1789_s4] sm:$0xff]  ;;  %s1666_s4 = smov [#allocation8]  }
 0x12e   :  { %v216_v30 = vadd.f32 %v215_v29, %v90_v26  ;;  %v217_v31 = vpop.f32.mrb[2].mxu0  ;;  %v361_v29 = vrot.slane %v1756_v27, %v85_v22  ;;  %s1172_s10 = sshll.u32 %s1666_s4, 4  ;;  %s1173_s10 = int_to_ptr.vmem [resolvable:$true] %s1172_s10 }
 0x12f   :  { %v218_v32 = vadd.f32 %v217_v31, %v86_v25  ;;  %v219_v33 = vpop.f32.mrb[3].mxu0  ;;  %v222_v35 = vmax.f32 %v214_v28, 0.0  ;;  %v1531_v25 = vld [vmem:[#allocation7 + $0x358] ss:$28 sps:$4 sm:$0xff]   ;;  %v372_v28 = vsub.s32 3, %v1735_v21  ;;  %v365_v31 = vrot.slane %v1756_v27, %v89_v24  ;;  %s1628_s11 = scalar_lea.vmem %s1173_s10, 1792  ;;  %p1633_p11 = scmp.lt.s32.totalorder %s1173_s10, %s1173_s10 }
 0x130   :  { %v220_v34 = vadd.f32 %v219_v33, %v90_v26  ;;  %v223_v37 = vmax.f32 %v216_v30, 0.0  ;;  %v368_v26 = vsub.s32 2, %v1735_v21  ;;  %p1629_p10 = scmp.ne.s32.totalorder %s1173_s10, %s1628_s11  ;;  %p1634_p12 = scmp.lt.s32.totalorder %s1628_s11, %s1628_s11 }
 0x131   :  { %v224_v36 = vmax.f32 %v218_v32, 0.0  ;;  %v373_v32 = vrot.slane %v1756_v27, %v372_v28 }
 0x132   :  { %v225_v38 = vmax.f32 %v220_v34, 0.0  ;;  %v369_v30 = vrot.slane %v1756_v27, %v368_v26  ;;  %p1635_p13 = por %p1634_p12, %p1633_p11 }
 0x133   :  { %v1746_v39 = vpack.c.bf16 %v224_v36, %v222_v35 }
 0x134   :  { %v227_v40 = vpack.c.bf16 %v225_v38, %v223_v37  ;;  %p1636_p0 = pnand %p1635_p13, %p1629_p10 }
 0x136   :  { %1001 = vmatprep.mubr.bf16.mxu1 %v227_v40  ;;  %1044 = vmatprep.mubr.bf16.mxu0 %v227_v40 }
 0x137   :  { %1002 = vmatmul.mubr.bf16.vlgmr.msra.gmra.mrb[0].mxu1 %v1746_v39  ;;  %1045 = vmatmul.mubr.bf16.vlgmr.msra.gmra.mrb[4].mxu0 %v1746_v39 }
 0x138   :  { %1056 = vmatpush1.bf16.msra.mxu1 %v1470_v41  ;;  %1315 = vmatpush3.bf16.msra.mxu0 %v1474_v42 }
 0x139   :  { %1087 = vmatprep.mubr.bf16.mxu1 %v227_v40  ;;  %1130 = vmatprep.mubr.bf16.mxu0 %v227_v40 }
 0x13a   :  { %1057 = vmatprep.subr.bf16.mxu1 %v1477_v43  ;;  %1316 = vmatprep.subr.bf16.mxu0 %v1478_v44 }
 0x13c   :  { %1058 = vmatpush1.bf16.msra.mxu1 %v1475_v45  ;;  %1317 = vmatpush3.bf16.msra.mxu0 %v1479_v46 }
 0x13d   :  { %1059 = vmatprep.subr.bf16.mxu1 %v1482_v47  ;;  %1318 = vmatprep.subr.bf16.mxu0 %v1483_v48 }
 0x140   :  { %1060 = vmatpush1.bf16.msra.mxu1 %v1480_v49  ;;  %1319 = vmatpush3.bf16.msra.mxu0 %v1484_v50 }
 0x141   :  { %1061 = vmatprep.subr.bf16.mxu1 %v1487_v51  ;;  %1320 = vmatprep.subr.bf16.mxu0 %v1488_v52 }
 0x144   :  { %1062 = vmatpush1.bf16.msra.mxu1 %v1485_v53  ;;  %1321 = vmatpush3.bf16.msra.mxu0 %v1489_v54 }
 0x145   :  { %1063 = vmatprep.subr.bf16.mxu1 %v1492_v55  ;;  %1322 = vmatprep.subr.bf16.mxu0 %v1493_v56  ;;  %v384_v55 = vsub.s32 6, %v1735_v21 }
 0x148   :  { %1064 = vmatpush1.bf16.msra.mxu1 %v1490_v57  ;;  %1323 = vmatpush3.bf16.msra.mxu0 %v1494_v58  ;;  %v385_v57 = vrot.slane %v1756_v27, %v384_v55 }
 0x149   :  { %1065 = vmatprep.subr.bf16.mxu1 %v1497_v59  ;;  %1324 = vmatprep.subr.bf16.mxu0 %v1498_v60 }
 0x14c   :  { %1066 = vmatpush1.bf16.msra.mxu1 %v1495_v61  ;;  %1325 = vmatpush3.bf16.msra.mxu0 %v1499_v62 }
 0x14d   :  { %1067 = vmatprep.subr.bf16.mxu1 %v1502_v63  ;;  %1326 = vmatprep.subr.bf16.mxu0 %v1503_v0 }
 0x150   :  { %1068 = vmatpush1.bf16.msra.mxu1 %v1500_v1  ;;  %1327 = vmatpush3.bf16.msra.mxu0 %v1504_v2 }
 0x151   :  { %1069 = vmatprep.subr.bf16.mxu1 %v1507_v3  ;;  %1328 = vmatprep.subr.bf16.mxu0 %v1508_v4  ;;  %v376_v3 = vsub.s32 4, %v1735_v21  ;;  %v380_v4 = vsub.s32 5, %v1735_v21 }
 0x154   :  { %1070 = vmatpush1.bf16.msra.mxu1 %v1505_v5  ;;  %1329 = vmatpush3.bf16.msra.mxu0 %v1509_v6  ;;  %v377_v5 = vrot.slane %v1756_v27, %v376_v3  ;;  %v381_v6 = vrot.slane %v1756_v27, %v380_v4 }
 0x155   :  { %1071 = vmatprep.subr.bf16.mxu1 %v1512_v7 }
 0x157   :  { %1131 = vmatmul.mubr.bf16.vlgmr.msra.gmra.mrb[8].mxu0 %v1746_v39 }
 0x158   :  { %1072 = vmatpush1.bf16.msra.mxu1 %v1510_v8 }
 0x159   :  { %1073 = vmatprep.subr.bf16.mxu1 %v1515_v9 }
 0x15c   :  { %1074 = vmatpush1.bf16.msra.mxu1 %v1513_v10 }
 0x15d   :  { %1075 = vmatprep.subr.bf16.mxu1 %v1518_v11 }
 0x160   :  { %1076 = vmatpush1.bf16.msra.mxu1 %v1516_v12 }
 0x161   :  { %1077 = vmatprep.subr.bf16.mxu1 %v1521_v13 }
 0x164   :  { %1078 = vmatpush1.bf16.msra.mxu1 %v1519_v14 }
 0x165   :  { %1079 = vmatprep.subr.bf16.mxu1 %v1524_v15 }
 0x168   :  { %1080 = vmatpush1.bf16.msra.mxu1 %v1522_v16 }
 0x169   :  { %1081 = vmatprep.subr.bf16.mxu1 %v1527_v17 }
 0x16c   :  { %1082 = vmatpush1.bf16.msra.mxu1 %v1525_v18 }
 0x16d   :  { %1083 = vmatprep.subr.bf16.mxu1 %v1530_v19 }
 0x170   :  { %1084 = vmatpush1.bf16.msra.mxu1 %v1528_v20 }
 0x171   :  { %1085 = vmatprep.subr.bf16.mxu1 %v1533_v23 }
 0x174   :  { %1086 = vmatpush1.bf16.msra.mxu1 %v1531_v25 }
 0x177   :  { %1088 = vmatmul.mubr.bf16.vlgmr.msra.gmra.mrb[4].mxu1 %v1746_v39 }
 0x20a   :  { %v1003_v33 = vpop.f32.mrb[0].mxu1  ;;  %v1046_v34 = vpop.f32.mrb[4].mxu0 }
 0x20b   :  { %v1004_v35 = vadd.f32 %v1003_v33, %v361_v29  ;;  %v1047_v36 = vadd.f32 %v1046_v34, %v369_v30  ;;  %v1005_v37 = vpop.f32.mrb[1].mxu1  ;;  %v1048_v38 = vpop.f32.mrb[5].mxu0 }
 0x20c   :  { %v1006_v39 = vadd.f32 %v1005_v37, %v365_v31  ;;  %v1049_v40 = vadd.f32 %v1048_v38, %v373_v32  ;;  %v1007_v41 = vpop.f32.mrb[2].mxu1  ;;  %v1050_v42 = vpop.f32.mrb[6].mxu0 }
 0x20d   :  { %1534 = vtanh.f32 %v1004_v35  ;;  %v1008_v22 = vadd.f32 %v1007_v41, %v361_v29  ;;  %v1009_v43 = vpop.f32.mrb[3].mxu1  ;;  %v1052_v44 = vpop.f32.mrb[7].mxu0  ;;  %v1051_v45 = vadd.f32 %v1050_v42, %v369_v30 }
 0x20e   :  { %1536 = vtanh.f32 %v1047_v36  ;;  %v1010_v24 = vadd.f32 %v1009_v43, %v365_v31  ;;  %v1053_v46 = vadd.f32 %v1052_v44, %v373_v32 }
 0x20f   :  { %1538 = vtanh.f32 %v1006_v39 }
 0x210   :  { %1540 = vtanh.f32 %v1049_v40 }
 0x211   :  { %1542 = vtanh.f32 %v1008_v22 }
 0x212   :  { %1544 = vtanh.f32 %v1051_v45 }
 0x213   :  { %1546 = vtanh.f32 %v1010_v24 }
 0x214   :  { %1548 = vtanh.f32 %v1053_v46 }
 0x217   :  { %v1535_v47 = vpop.eup %1534 }
 0x218   :  { %v1537_v48 = vpop.eup %1536  ;;  %1153 = vst [vmem:[#allocation8] sm:$0xff] %v1535_v47 }
 0x219   :  { %v1539_v49 = vpop.eup %1538  ;;  %1155 = vst [vmem:[#allocation8 + $0x10] sm:$0xff] %v1537_v48 }
 0x21a   :  { %v1541_v50 = vpop.eup %1540  ;;  %1154 = vst [vmem:[#allocation8 + $0x8] sm:$0xff] %v1539_v49 }
 0x21b   :  { %v1543_v51 = vpop.eup %1542  ;;  %1156 = vst [vmem:[#allocation8 + $0x18] sm:$0xff] %v1541_v50 }
 0x21c   :  { %v1545_v52 = vpop.eup %1544  ;;  %1160 = vst [vmem:[#allocation8 + $0x38] sm:$0xff] %v1543_v51 }
 0x21d   :  { %v1547_v53 = vpop.eup %1546  ;;  %1162 = vst [vmem:[#allocation8 + $0x48] sm:$0xff] %v1545_v52 }
 0x21e   :  { %v1549_v54 = vpop.eup %1548  ;;  %1161 = vst [vmem:[#allocation8 + $0x40] sm:$0xff] %v1547_v53 }
 0x21f   :  { %1163 = vst [vmem:[#allocation8 + $0x50] sm:$0xff] %v1549_v54 }
 0x22a   :  { %v1330_v56 = vpop.f32.mrb[8].mxu0 }
 0x22b   :  { %v1331_v58 = vpop.f32.mrb[9].mxu0 }
 0x22c   :  { %v1332_v59 = vadd.f32 %v1331_v58, %v1330_v56  ;;  %v1333_v60 = vpop.f32.mrb[10].mxu0 }
 0x22d   :  { %v1334_v61 = vpop.f32.mrb[11].mxu0 }
 0x22e   :  { %v1133_v62 = vadd.f32 %v1332_v59, %v385_v57  ;;  %v1335_v63 = vadd.f32 %v1334_v61, %v1333_v60 }
 0x230   :  { %1550 = vtanh.f32 %v1133_v62  ;;  %v1136_v0 = vadd.f32 %v1335_v63, %v385_v57 }
 0x232   :  { %1552 = vtanh.f32 %v1136_v0 }
 0x23a   :  { %v1551_v1 = vpop.eup %1550 }
 0x23b   :  { %1159 = vst [vmem:[#allocation8 + $0x30] sm:$0xff] %v1551_v1 }
 0x23c   :  { %v1553_v2 = vpop.eup %1552 }
 0x23d   :  { %1166 = vst [vmem:[#allocation8 + $0x68] sm:$0xff] %v1553_v2 }
 0x24a   :  { %v1089_v7 = vpop.f32.mrb[4].mxu1 }
 0x24b   :  { %v1090_v8 = vadd.f32 %v1089_v7, %v377_v5  ;;  %v1091_v9 = vpop.f32.mrb[5].mxu1 }
 0x24c   :  { %v1092_v10 = vadd.f32 %v1091_v9, %v381_v6  ;;  %v1093_v11 = vpop.f32.mrb[6].mxu1 }
 0x24d   :  { %1554 = vtanh.f32 %v1090_v8  ;;  %v1094_v12 = vadd.f32 %v1093_v11, %v377_v5  ;;  %v1095_v13 = vpop.f32.mrb[7].mxu1 }
 0x24e   :  { %1556 = vtanh.f32 %v1092_v10  ;;  %v1096_v14 = vadd.f32 %v1095_v13, %v381_v6 }
 0x24f   :  { %1558 = vtanh.f32 %v1094_v12 }
 0x250   :  { %1560 = vtanh.f32 %v1096_v14 }
 0x257   :  { %v1555_v15 = vpop.eup %1554 }
 0x258   :  { %v1557_v21 = vpop.eup %1556  ;;  %1157 = vst [vmem:[#allocation8 + $0x20] sm:$0xff] %v1555_v15 }
 0x259   :  { %v1559_v16 = vpop.eup %1558  ;;  %1158 = vst [vmem:[#allocation8 + $0x28] sm:$0xff] %v1557_v21 }
 0x25a   :  { %v1561_v17 = vpop.eup %1560  ;;  %1164 = vst [vmem:[#allocation8 + $0x58] sm:$0xff] %v1559_v16 }
 0x25b   :  { %1165 = vst [vmem:[#allocation8 + $0x60] sm:$0xff] %v1561_v17 }
 0x25c   :  { %1639 = shalt.err (!%p1636_p0)
}
 0x25d   :  { %s1640_s14 = scalar_lea.hbm %s1790_s5, 1792 }
 0x25e   :  { %p1641_p1 = scmp.ne.s32.totalorder %s1790_s5, %s1640_s14  ;;  %p1644_p2 = scmp.lt.u32.totalorder %s1640_s14, %s1790_s5 }
 0x260   :  { %p1646_p3 = pnand %p1644_p2, %p1641_p1 }
 0x262   :  { %1649 = shalt.err (!%p1646_p3)
}
 0x263   :  { %s1667_s18 = smov 896   ;;  %s1668_s19 = smov 56  }
 0x264   :  { %1178 = dma.vmem_to_hbm [thread:$0]  %s1173_s10, 1792, %s1790_s5, [#allocation4], %s1667_s18, %s1667_s18, %s1668_s19  }
 0x265   :  { %1654 = dma.done.wait [#allocation4], 1792  }
 0x266   :  { %1655 = vsyncadd [#allocation4], 4294965504 }
 0x267   :  { %1182 = vsyncpa [#allocation3], 1 }
 0x268   :  { %1183 = vsyncpa [#allocation6], 1 }
 0x269   :  { %1184 = vsyncpa [#allocation4], 1 }

</bundles_post_ra>
